<compile_context>
chip_gen: v5e
topology: v5e:2x2
jax: 0.10.0
libtpu: 0.0.40
codegen_flags: <defaults>
</compile_context>

<pallas_src>
import jax
import jax.numpy as jnp
from jax.experimental import pallas as pl
from jax.experimental.pallas import tpu as pltpu


def _identity_kernel(x_ref, o_ref):
    # Pure pass-through: load the current VMEM tile and store it unchanged.
    o_ref[...] = x_ref[...]


def _largest_lane_divisor(total: int, cap: int = 8192) -> int:
    """Largest multiple of 128 (<= cap) that evenly divides `total`, else 0."""
    lanes = (min(cap, total) // 128) * 128
    while lanes >= 128:
        if total % lanes == 0:
            return lanes
        lanes -= 128
    return 0


def _block_target_bytes() -> int:
    """~4 MiB tiles on v5e/v6e (128 MiB VMEM), ~2 MiB on v7x / unknown."""
    try:
        kind = jax.devices()[0].device_kind.lower()
    except Exception:  # pragma: no cover - defensive
        kind = ""
    if "v5" in kind or "v6" in kind:
        return 4 * 1024 * 1024
    return 2 * 1024 * 1024


def base_forward(x: jax.Array, *, force_kernel: bool = False) -> jax.Array:
    """Identity forward for the abstract `Base` module.

    By default the identity is elided entirely (returns x) — launching a
    zero-compute copy kernel only adds HBM traffic and launch overhead.
    Set force_kernel=True to route the data through the tiled Pallas copy
    (used here to demonstrate / validate the kernel path).
    """
    orig_shape = x.shape
    total = x.size
    itemsize = jnp.dtype(x.dtype).itemsize

    # --- structural short-circuits: the biggest perf lever is not launching.
    if total == 0:
        return x
    if not force_kernel:
        # Identity: nothing to compute. (Also covers the "tiny input" bypass
        # where grid-step + launch overhead would dominate the copy.)
        return x

    # --- lane-dense layout: largest multiple-of-128 divisor of the element
    # count (cap 8192); otherwise pad the flattened array up to a multiple of
    # 128 so every store stays an unmasked full-width vst.
    lanes = _largest_lane_divisor(total)
    pad = 0
    if lanes:
        x2d = x.reshape(total // lanes, lanes)
    else:
        lanes = 128
        padded_total = pl.cdiv(total, lanes) * lanes
        pad = padded_total - total
        flat = x.reshape(total)
        if pad:
            flat = jnp.pad(flat, (0, pad))
        x2d = flat.reshape(padded_total // lanes, lanes)

    rows, cols = x2d.shape

    # --- dtype-aware sublane packing: 8 rows for 32-bit, 16 for bf16, 32 for
    # int8/fp8 so packed dtypes keep full vregs on the load/store path.
    sub = max(8, 32 // max(1, itemsize))

    # --- block sizing: generation-aware byte target, rounded to the packed
    # sublane multiple; ensure >= 2 grid steps when rows allow so the
    # "parallel" axis can be split across v7x's two TensorCores.
    target_block_bytes = _block_target_bytes()
    tile_rows = max(1, target_block_bytes // max(1, cols * itemsize))
    if tile_rows >= rows:
        if rows >= 2 * sub:
            half = pl.cdiv(rows, 2)
            tile_rows = max(sub, (half // sub) * sub)
        else:
            tile_rows = rows  # full extent -> always a legal block shape
    else:
        tile_rows = max(sub, (tile_rows // sub) * sub)

    grid = (pl.cdiv(rows, tile_rows),)

    out2d = pl.pallas_call(
        _identity_kernel,
        out_shape=jax.ShapeDtypeStruct((rows, cols), x2d.dtype),
        grid_spec=pl.GridSpec(
            grid=grid,
            in_specs=[pl.BlockSpec((tile_rows, cols), lambda i: (i, 0))],
            out_specs=pl.BlockSpec((tile_rows, cols), lambda i: (i, 0)),
        ),
        # Correct unconditionally; only saves HBM traffic if the caller
        # donates x at the jit boundary (jax.jit(..., donate_argnums=0)).
        input_output_aliases={0: 0},
        compiler_params=pltpu.CompilerParams(
            dimension_semantics=("parallel",),
            # Worst case: 2 arrays x 2 pipeline buffers x 4 MiB = 16 MiB,
            # well under the 32 MiB scoped budget on every generation
            # (v7x physical VMEM is 64 MiB).
            vmem_limit_bytes=32 * 1024 * 1024,
        ),
        cost_estimate=pl.CostEstimate(
            flops=0,
            transcendentals=0,
            bytes_accessed=2 * rows * cols * itemsize,
        ),
    )(x2d)

    out_flat = out2d.reshape(-1)
    if pad:
        out_flat = out_flat[:total]
    return out_flat.reshape(orig_shape)


if __name__ == "__main__":
    key = jax.random.PRNGKey(0)

    # Small NCHW input consistent with a conv-style base model.
    x = jax.random.normal(key, (2, 4, 16, 16), dtype=jnp.float32)

    # Default (optimized) path: identity is elided entirely.
    y_fast = base_forward(x)
    jax.block_until_ready(y_fast)
    assert y_fast.shape == x.shape and y_fast.dtype == x.dtype
    assert bool(jnp.allclose(y_fast, x))

    # Forced kernel path: exercises the lane-dense tiled Pallas copy.
    y = base_forward(x, force_kernel=True)
    jax.block_until_ready(y)
    assert y.shape == x.shape and y.dtype == x.dtype
    assert bool(jnp.allclose(y, x))

    # Awkward shape (no multiple-of-128 divisor) -> exercises the pad path.
    x_odd = jax.random.normal(jax.random.PRNGKey(1), (2, 3, 5, 7),
                              dtype=jnp.float32)
    y_odd = base_forward(x_odd, force_kernel=True)
    jax.block_until_ready(y_odd)
    assert y_odd.shape == x_odd.shape and y_odd.dtype == x_odd.dtype
    assert bool(jnp.allclose(y_odd, x_odd))

    print("KERNEL_OK")
</pallas_src>

<mosaic_0001>
module attributes {stable_mosaic.version = 11 : i64} {
  func.func @_identity_kernel(%arg0: i32, %arg1: memref<1x2048xf32, #tpu.memory_space<vmem>>, %arg2: memref<1x2048xf32, #tpu.memory_space<vmem>>) attributes {dimension_semantics = [#tpu.dimension_semantics<parallel>], iteration_bounds = array<i64: 1>, scalar_prefetch = 0 : i64, scratch_operands = 0 : i64, tpu.core_type = #tpu.core_type<tc>, window_params = [{transform_indices = @transform_0, window_bounds = array<i64: 1, 2048>}, {transform_indices = @transform_1, window_bounds = array<i64: 1, 2048>}]} {
    %c0 = arith.constant 0 : index
    %c0_0 = arith.constant 0 : index
    %0 = vector.load %arg1[%c0, %c0_0] : memref<1x2048xf32, #tpu.memory_space<vmem>>, vector<1x2048xf32>
    %c0_1 = arith.constant 0 : index
    %c0_2 = arith.constant 0 : index
    %1 = vector.load %arg2[%c0_1, %c0_2] : memref<1x2048xf32, #tpu.memory_space<vmem>>, vector<1x2048xf32>
    tpu.vector_store %arg2[%c0_1, %c0_2], %0 {strides = array<i32>} : memref<1x2048xf32, #tpu.memory_space<vmem>>, vector<1x2048xf32>,
    return
  }
  func.func @transform_0(%arg0: i32) -> (i32, i32) {
    %c0_i32 = arith.constant 0 : i32
    %c0_i32_0 = arith.constant 0 : i32
    return %arg0, %c0_i32 : i32, i32
  }
  func.func @transform_1(%arg0: i32) -> (i32, i32) {
    %c0_i32 = arith.constant 0 : i32
    %c0_i32_0 = arith.constant 0 : i32
    return %arg0, %c0_i32 : i32, i32
  }
}

</mosaic_0001>

<bundles_post_ra>
// kernel: tpu_custom_call.1
= control target key start
LH: loop header
LB: loop body
LE: loop exit
PB: predicated region body
PF: predicated region fallthrough
CT: control target
= control target key end

     0   :  { %6 = vsyncpa [#allocation3], 0  ;;  %s116_s0 = inlined_call_operand.hbm [shape: f32[1,2048], index: 0, kind: input, shape index: {}, may-alias: {0,1}]   ;;  %s117_s1 = inlined_call_operand.hbm [shape: f32[1,2048], index: 1, kind: output, shape index: {}, may-alias: {0,1}]  }
   0x1   :  { %7 = vsyncpa [#allocation4], 0  ;;  %s13_s8 = sshll.u32 %s116_s0, 4  ;;  %s98_s9 = smov [#allocation2]   ;;  %s14_s8 = int_to_ptr.hbm [resolvable:$true] %s13_s8 }
   0x2   :  { %s15_s10 = sshll.u32 %s98_s9, 4  ;;  %s16_s10 = int_to_ptr.vmem [resolvable:$true] %s15_s10 }
   0x3   :  { %18 = dma.hbm_to_vmem [thread:$0]  %s14_s8, 256, %s16_s10, [#allocation3]  }
   0x4   :  { %94 = dma.done.wait [#allocation3], 256  }
   0x5   :  { %95 = vsyncadd [#allocation3], 4294967040  ;;  %s99_s11 = smov [#allocation5]   ;;  %s34_s15 = sshll.u32 %s117_s1, 4  ;;  %v23_v0 = vld [vmem:[#allocation2] sm:$0xff]  ;;  %v24_v1 = vld [vmem:[#allocation2 + $0x8] sm:$0xff]  ;;  %s35_s15 = int_to_ptr.hbm [resolvable:$true] %s34_s15 }
   0x6   :  { %s32_s12 = sshll.u32 %s99_s11, 4  ;;  %25 = vst [vmem:[#allocation5] sm:$0xff] %v23_v0  ;;  %s33_s12 = int_to_ptr.vmem [resolvable:$true] %s32_s12 }
   0x7   :  { %26 = vst [vmem:[#allocation5 + $0x8] sm:$0xff] %v24_v1 }
   0x8   :  { %37 = dma.vmem_to_hbm [thread:$0]  %s33_s12, 256, %s35_s15, [#allocation4]  }
   0x9   :  { %96 = dma.done.wait [#allocation4], 256  }
   0xa   :  { %97 = vsyncadd [#allocation4], 4294967040 }
   0xb   :  { %42 = vsyncpa [#allocation3], 1 }
   0xc   :  { %43 = vsyncpa [#allocation4], 1 }

</bundles_post_ra>
